<compile_context>
chip_gen: v5e
topology: v5e:2x2
jax: 0.10.0
libtpu: 0.0.40
codegen_flags: <defaults>
</compile_context>

<pallas_src>
import functools
import math

import jax
import jax.numpy as jnp
from jax.experimental import pallas as pl
from jax.experimental.pallas import tpu as pltpu

MIN_NORM = 1e-15
EPS = 1e-7            # Hyperboloid.eps[torch.float32]
MAX_SINH_ARG = 15.0   # clamp used by HGCN math_utils cosh/sinh

CURVATURE = 1.0
NETWORK = "resSumGCN"
NUM_LAYERS = 3        # -> num_gcn_layers = NUM_LAYERS - 1 = 2

ADJ_DTYPE = jnp.bfloat16   # bf16 adj: halves the dominant N^2 HBM stream + native bf16 MXU
H_DTYPE = jnp.bfloat16     # bf16 inter-layer h / residual carries: halves RHS re-streaming
VMEM_LIMIT_BYTES = 48 * 1024 * 1024   # tiles below use ~12 MiB double-buffered; fits v7x 64 MiB


# ---------------------------- tiling helpers ----------------------------

def _round_up(v, m):
    return -(-v // m) * m


def _choose_tiles(n, tile_m=None, tile_k=None):
    """Return (Npad, TM, TK) honoring the (8,128) block rules.

    * Explicit override (used by the tiled-path correctness test): pad N to lcm(TM, TK).
    * n <= 1024: one whole (full-dim) block, no streaming needed.
    * Larger graphs: Npad aligned to 512 so tiles never collapse; TM up to 1024 (cuts the
      Npad/TM re-streaming of h), TK up to 2048 (adj tile >= ~2 MiB bf16 per grid step).
      Npad//TM >= 2 whenever we tile, so the row axis can shard across the 2 v7x TensorCores.
    """
    if tile_m is not None or tile_k is not None:
        tm = tile_m or tile_k
        tk = tile_k or tile_m
        return _round_up(n, math.lcm(tm, tk)), tm, tk
    if n <= 1024:
        npad = _round_up(n, 8)
        return npad, npad, npad
    npad = _round_up(n, 512)

    def _pick(cap):
        t = cap
        while npad % t:
            t -= 512
        return t

    return npad, _pick(1024), _pick(2048)


# ---------------------------- in-kernel hyperboloid math ----------------------------

def _logmap0_math(x, c):
    """Hyperboloid logmap at the origin: res[:,0]=0, res[:,1:]=sqrtK*arcosh(x0/sqrtK)*y/||y||."""
    K = 1.0 / c
    sqrtK = K ** 0.5
    col = jax.lax.broadcasted_iota(jnp.int32, x.shape, 1)
    is_space = col > 0
    y = jnp.where(is_space, x, 0.0)                                # space part (cols 1:)
    y_norm = jnp.sqrt(jnp.sum(y * y, axis=-1, keepdims=True))
    y_norm = jnp.maximum(y_norm, MIN_NORM)
    theta = jnp.maximum(x[:, 0:1] / sqrtK, 1.0 + EPS)
    arcosh = jnp.log(theta + jnp.sqrt(jnp.maximum(theta * theta - 1.0, EPS)))
    inv_norm = pl.reciprocal(y_norm, approx=True)                  # EUP slot, ~free
    res = (sqrtK * arcosh) * y * inv_norm
    return jnp.where(is_space, res, 0.0)


def _expmap0_proj_math(u, c):
    """Fused Hyperboloid expmap0 + proj (time coordinate recomputed as sqrt(K + ||space||^2))."""
    K = 1.0 / c
    sqrtK = K ** 0.5
    col = jax.lax.broadcasted_iota(jnp.int32, u.shape, 1)
    is_space = col > 0
    xs = jnp.where(is_space, u, 0.0)
    x_norm = jnp.sqrt(jnp.sum(xs * xs, axis=-1, keepdims=True))
    x_norm = jnp.maximum(x_norm, MIN_NORM)
    theta = jnp.clip(x_norm / sqrtK, -MAX_SINH_ARG, MAX_SINH_ARG)
    # Exact exp(-theta) (same EUP cost) instead of approx-reciprocal of exp(theta): the latter
    # cancels badly for small theta (near-origin points).
    sinh_theta = 0.5 * (jnp.exp(theta) - jnp.exp(-theta))
    space = (sqrtK * sinh_theta) * xs * pl.reciprocal(x_norm, approx=True)
    sp_sqnorm = jnp.sum(space * space, axis=-1, keepdims=True)
    time = jnp.sqrt(jnp.maximum(K + sp_sqnorm, EPS))
    return jnp.where(is_space, space, time)


# ---------------------------- standalone logmap0 pass ----------------------------

def _logmap0_kernel(x_ref, o_ref, *, c):
    o_ref[...] = _logmap0_math(x_ref[...].astype(jnp.float32), c).astype(o_ref.dtype)


def _logmap0_pass(x_p, *, c, tm):
    """One-shot elementwise logmap0 over the padded node matrix (bf16 output feeds the MXU)."""
    npad, dpad = x_p.shape
    return pl.pallas_call(
        functools.partial(_logmap0_kernel, c=c),
        out_shape=jax.ShapeDtypeStruct((npad, dpad), H_DTYPE),
        grid_spec=pltpu.PrefetchScalarGridSpec(
            num_scalar_prefetch=0,
            grid=(npad // tm,),
            in_specs=[pl.BlockSpec((tm, dpad), lambda i: (i, 0))],
            out_specs=pl.BlockSpec((tm, dpad), lambda i: (i, 0)),
        ),
        compiler_params=pltpu.CompilerParams(
            dimension_semantics=("parallel",),
            vmem_limit_bytes=VMEM_LIMIT_BYTES,
        ),
    )(x_p)


# ---------------------------- fused GCN-layer kernel ----------------------------

def _fused_layer_kernel(*refs, c, has_extra, add_extra, emit_carry, last):
    """One GCN layer tile:  acc_i = sum_k adj[i,k] @ H[k]   (bf16 x bf16 -> f32 MXU).

    Epilogue (last k step, per row tile):
      h_new = acc + extra   if add_extra   else acc
      carry = extra + h_new                (only if emit_carry: resSum / denseGCN running sum)
      out0  = proj(expmap0(h_new, c), c)   if last layer   else h_new   (bf16 carry for next layer)
    """
    adj_ref, hk_ref = refs[0], refs[1]
    pos = 2
    extra_ref = None
    if has_extra:
        extra_ref = refs[pos]
        pos += 1
    out0_ref = refs[pos]
    pos += 1
    carry_ref = None
    if emit_carry:
        carry_ref = refs[pos]
        pos += 1
    acc_ref = refs[pos]

    k = pl.program_id(1)
    nk = pl.num_programs(1)

    @pl.when(k == 0)
    def _init():
        acc_ref[...] = jnp.zeros_like(acc_ref)

    # Native bf16 MXU path: no f32 upcast of the adj tile; accumulate in f32 scratch.
    acc_ref[...] += jnp.dot(adj_ref[...], hk_ref[...].astype(ADJ_DTYPE),
                            preferred_element_type=jnp.float32)

    @pl.when(k == nk - 1)
    def _finish():
        acc = acc_ref[...]
        if add_extra or emit_carry:
            extra = extra_ref[...].astype(jnp.float32)
        h_new = (acc + extra) if add_extra else acc
        if emit_carry:
            carry_ref[...] = (extra + h_new).astype(carry_ref.dtype)
        res = _expmap0_proj_math(h_new, c) if last else h_new
        out0_ref[...] = res.astype(out0_ref.dtype)


def _fused_layer(adj, h, extra, *, c, last, add_extra, emit_carry, tm, tk):
    npad, dpad = h.shape
    grid = (npad // tm, npad // tk)
    has_extra = extra is not None

    in_specs = [
        pl.BlockSpec((tm, tk), lambda i, k: (i, k)),      # adj tile (bf16, streamed)
        pl.BlockSpec((tk, dpad), lambda i, k: (k, 0)),    # h (bf16, reduction-indexed)
    ]
    inputs = [adj, h]
    if has_extra:
        in_specs.append(pl.BlockSpec((tm, dpad), lambda i, k: (i, 0)))  # residual / running sum
        inputs.append(extra)

    out0_dtype = jnp.float32 if last else H_DTYPE
    row_spec = pl.BlockSpec((tm, dpad), lambda i, k: (i, 0))
    if emit_carry:
        out_shape = (jax.ShapeDtypeStruct((npad, dpad), out0_dtype),
                     jax.ShapeDtypeStruct((npad, dpad), H_DTYPE))
        out_specs = (row_spec, row_spec)
    else:
        out_shape = jax.ShapeDtypeStruct((npad, dpad), out0_dtype)
        out_specs = row_spec

    kernel = functools.partial(_fused_layer_kernel, c=c, has_extra=has_extra,
                               add_extra=add_extra, emit_carry=emit_carry, last=last)
    return pl.pallas_call(
        kernel,
        out_shape=out_shape,
        grid_spec=pltpu.PrefetchScalarGridSpec(
            num_scalar_prefetch=0,
            grid=grid,
            in_specs=in_specs,
            out_specs=out_specs,
            scratch_shapes=[pltpu.VMEM((tm, dpad), jnp.float32)],   # f32 accumulator
        ),
        compiler_params=pltpu.CompilerParams(
            dimension_semantics=("parallel", "arbitrary"),   # rows shard across TCs on v7x
            vmem_limit_bytes=VMEM_LIMIT_BYTES,
        ),
    )(*inputs)


# ------------------- StackGCNs networks (fused residual handling) -------------------

def _plain_gcn(adj, h, L, c, tm, tk):
    for l in range(L):
        h = _fused_layer(adj, h, None, c=c, last=(l == L - 1),
                         add_extra=False, emit_carry=False, tm=tm, tk=tk)
    return h


def _res_sum_gcn(adj, h, L, c, tm, tk):
    h = _fused_layer(adj, h, None, c=c, last=(L == 1),
                     add_extra=False, emit_carry=False, tm=tm, tk=tk)
    if L == 1:
        return h
    s = h
    for l in range(1, L):
        if l == L - 1:
            return _fused_layer(adj, h, s, c=c, last=True,
                                add_extra=True, emit_carry=False, tm=tm, tk=tk)
        h, s = _fused_layer(adj, h, s, c=c, last=False,
                            add_extra=False, emit_carry=True, tm=tm, tk=tk)


def _res_add_gcn(adj, h, L, c, tm, tk):
    h = _fused_layer(adj, h, None, c=c, last=(L == 1),
                     add_extra=False, emit_carry=False, tm=tm, tk=tk)
    for l in range(1, L):
        h = _fused_layer(adj, h, h, c=c, last=(l == L - 1),
                         add_extra=True, emit_carry=False, tm=tm, tk=tk)
    return h


def _dense_gcn(adj, h, L, c, tm, tk):
    h = _fused_layer(adj, h, None, c=c, last=(L == 1),
                     add_extra=False, emit_carry=False, tm=tm, tk=tk)
    if L == 1:
        return h
    s = h
    for l in range(1, L):
        if l == L - 1:
            return _fused_layer(adj, h, s, c=c, last=True,
                                add_extra=True, emit_carry=False, tm=tm, tk=tk)
        # running dense sum s_{l+1} = s_l + h_{l+1} is the in-kernel carry output
        h, s = _fused_layer(adj, h, s, c=c, last=False,
                            add_extra=True, emit_carry=True, tm=tm, tk=tk)


_NETWORKS = dict(plainGCN=_plain_gcn, resSumGCN=_res_sum_gcn,
                 resAddGCN=_res_add_gcn, denseGCN=_dense_gcn)


# ---------------------------- HypAgg forward ----------------------------

def hyp_agg_forward(x, adj, *, c=CURVATURE, network=NETWORK, num_layers=NUM_LAYERS,
                    tile_m=None, tile_k=None):
    n, d = x.shape
    L = num_layers - 1
    assert L >= 1, "need at least one GCN layer"
    npad, tm, tk = _choose_tiles(n, tile_m, tile_k)
    dpad = _round_up(d, 128)  # lane-dense feature dim for h / outputs (full vst, no vst.msk)

    x_p = jnp.zeros((npad, dpad), jnp.float32).at[:n, :d].set(x.astype(jnp.float32))
    adj_p = jnp.zeros((npad, npad), jnp.float32).at[:n, :n].set(adj.astype(jnp.float32))
    adj_p = adj_p.astype(ADJ_DTYPE)

    h0 = _logmap0_pass(x_p, c=c, tm=tm)                 # one-shot logmap0 (bf16 x_tangent)
    res = _NETWORKS[network](adj_p, h0, L, c, tm, tk)   # fused GCN layers, expmap0+proj in last
    return res[:n, :d]


# ---------------------------- pure-JAX reference (f32) ----------------------------

def _reference_forward(x, adj, c, network, num_layers):
    K = 1.0 / c
    sqrtK = K ** 0.5
    mask = (jnp.arange(x.shape[1]) > 0)[None, :]

    def logmap0(v):
        y = jnp.where(mask, v, 0.0)
        y_norm = jnp.maximum(jnp.sqrt(jnp.sum(y * y, -1, keepdims=True)), MIN_NORM)
        theta = jnp.maximum(v[:, 0:1] / sqrtK, 1.0 + EPS)
        arcosh = jnp.log(theta + jnp.sqrt(jnp.maximum(theta * theta - 1.0, EPS)))
        return jnp.where(mask, sqrtK * arcosh * y / y_norm, 0.0)

    def expmap0_proj(u):
        xs = jnp.where(mask, u, 0.0)
        x_norm = jnp.maximum(jnp.sqrt(jnp.sum(xs * xs, -1, keepdims=True)), MIN_NORM)
        theta = jnp.clip(x_norm / sqrtK, -MAX_SINH_ARG, MAX_SINH_ARG)
        space = sqrtK * jnp.sinh(theta) * xs / x_norm
        time = jnp.sqrt(jnp.maximum(K + jnp.sum(space * space, -1, keepdims=True), EPS))
        return jnp.where(mask, space, time)

    L = num_layers - 1
    xt = logmap0(x)
    outs = [xt]
    for i in range(L):
        outs.append(adj @ outs[i])
    if network == "plainGCN":
        h = outs[-1]
    elif network == "resSumGCN":
        h = functools.reduce(lambda a, b: a + b, outs[1:])
    elif network == "resAddGCN":
        h = outs[1]
        for _ in range(1, L):
            h = h + adj @ h
    else:  # denseGCN
        d_outs = [xt, adj @ xt]
        for i in range(1, L):
            d_outs.append(functools.reduce(lambda a, b: a + b, d_outs[1:i + 1]) + adj @ d_outs[i])
        h = d_outs[-1]
    return expmap0_proj(h)


# ---------------------------- demo ----------------------------

def _make_inputs(key, n, d):
    k1, k2 = jax.random.split(key)
    # Valid points on the Hyperboloid: random space part, time coord so <x,x>_L = -K.
    space = 0.1 * jax.random.normal(k1, (n, d - 1), dtype=jnp.float32)
    K = 1.0 / CURVATURE
    time = jnp.sqrt(K + jnp.sum(space * space, axis=-1, keepdims=True))
    x = jnp.concatenate([time, space], axis=-1)
    # Dense row-normalized adjacency with self-loops (dense stand-in for the sparse adj).
    logits = jax.random.uniform(k2, (n, n), dtype=jnp.float32)
    a = (logits > 0.8).astype(jnp.float32) + jnp.eye(n, dtype=jnp.float32)
    adj = a / jnp.sum(a, axis=-1, keepdims=True)
    return x, adj


if __name__ == "__main__":
    key = jax.random.PRNGKey(0)
    k_small, k_tiled = jax.random.split(key)

    # 1) Small graph, default config (single-block path): N=32 nodes, in_features=16.
    N, D = 32, 16
    x, adj = _make_inputs(k_small, N, D)
    fwd = jax.jit(hyp_agg_forward)
    out = jax.block_until_ready(fwd(x, adj))
    assert out.shape == (N, D) and out.dtype == jnp.float32
    assert bool(jnp.all(jnp.isfinite(out)))
    # Loose tolerance: adj / h are streamed in bf16 inside the kernel (deliberate tradeoff).
    ref = _reference_forward(x, adj, CURVATURE, NETWORK, NUM_LAYERS)
    max_err = float(jnp.max(jnp.abs(out - ref)))
    assert max_err < 5e-2, f"single-block max abs err vs f32 reference too large: {max_err}"

    # 2) Tiled / multi-k-step path (forced small tiles to keep the demo small): exercises the
    #    pl.when accumulator init/finalize, bf16 adj/h streaming, and the residual-carry outputs
    #    for every network variant.  The auto-tiled large-N path runs the same kernel code with
    #    bigger (TM<=1024, TK<=2048) tiles.
    Nt, Dt = 300, 16
    xt, adjt = _make_inputs(k_tiled, Nt, Dt)
    for net in ("plainGCN", "resSumGCN", "resAddGCN", "denseGCN"):
        out_t = jax.block_until_ready(
            hyp_agg_forward(xt, adjt, c=CURVATURE, network=net, num_layers=4,
                            tile_m=128, tile_k=128))
        assert out_t.shape == (Nt, Dt) and bool(jnp.all(jnp.isfinite(out_t)))
        ref_t = _reference_forward(xt, adjt, CURVATURE, net, 4)
        err_t = float(jnp.max(jnp.abs(out_t - ref_t)))
        assert err_t < 5e-2, f"tiled path ({net}) max abs err too large: {err_t}"

    print("KERNEL_OK")
</pallas_src>

<mosaic_0001>
module attributes {stable_mosaic.version = 11 : i64} {
  func.func @_logmap0_kernel(%arg0: i32, %arg1: memref<32x128xf32, #tpu.memory_space<vmem>>, %arg2: memref<32x128xbf16, #tpu.memory_space<vmem>>) attributes {dimension_semantics = [#tpu.dimension_semantics<parallel>], iteration_bounds = array<i64: 1>, scalar_prefetch = 0 : i64, scratch_operands = 0 : i64, tpu.core_type = #tpu.core_type<tc>, window_params = [{transform_indices = @transform_0, window_bounds = array<i64: 32, 128>}, {transform_indices = @transform_1, window_bounds = array<i64: 32, 128>}]} {
    %c0 = arith.constant 0 : index
    %c0_0 = arith.constant 0 : index
    %0 = vector.load %arg1[%c0, %c0_0] : memref<32x128xf32, #tpu.memory_space<vmem>>, vector<32x128xf32>
    %1 = tpu.iota {dimensions = array<i32: 1>} : vector<32x128xi32>
    %c0_i32 = arith.constant 0 : i32
    %2 = vector.broadcast %c0_i32 : i32 to vector<32x128xi32>
    %3 = arith.cmpi sgt, %1, %2 : vector<32x128xi32>
    %cst = arith.constant 0.000000e+00 : f32
    %4 = vector.broadcast %cst : f32 to vector<32x128xf32>
    %5 = arith.select %3, %0, %4 : vector<32x128xi1>, vector<32x128xf32>
    %6 = arith.mulf %5, %5 : vector<32x128xf32>
    %cst_1 = arith.constant dense<0.000000e+00> : vector<32xf32>
    %7 = vector.multi_reduction <add>, %6, %cst_1 [1] : vector<32x128xf32> to vector<32xf32>
    %8 = vector.shape_cast %7 : vector<32xf32> to vector<32x1xf32>
    %9 = math.sqrt %8 : vector<32x1xf32>
    %cst_2 = arith.constant 1.000000e-15 : f32
    %10 = vector.broadcast %cst_2 : f32 to vector<32x1xf32>
    %11 = arith.maximumf %9, %10 : vector<32x1xf32>
    %12 = vector.extract_strided_slice %0 {offsets = [0, 0], sizes = [32, 1], strides = [1, 1]} : vector<32x128xf32> to vector<32x1xf32>
    %cst_3 = arith.constant 1.000000e+00 : f32
    %13 = vector.broadcast %cst_3 : f32 to vector<32x1xf32>
    %14 = arith.divf %12, %13 : vector<32x1xf32>
    %cst_4 = arith.constant 1.00000012 : f32
    %15 = vector.broadcast %cst_4 : f32 to vector<32x1xf32>
    %16 = arith.maximumf %14, %15 : vector<32x1xf32>
    %17 = arith.mulf %16, %16 : vector<32x1xf32>
    %cst_5 = arith.constant 1.000000e+00 : f32
    %18 = vector.broadcast %cst_5 : f32 to vector<32x1xf32>
    %19 = arith.subf %17, %18 : vector<32x1xf32>
    %cst_6 = arith.constant 1.000000e-07 : f32
    %20 = vector.broadcast %cst_6 : f32 to vector<32x1xf32>
    %21 = arith.maximumf %19, %20 : vector<32x1xf32>
    %22 = math.sqrt %21 : vector<32x1xf32>
    %23 = arith.addf %16, %22 : vector<32x1xf32>
    %24 = math.log %23 : vector<32x1xf32>
    %25 = tpu.reciprocal %11 {approx = true} : vector<32x1xf32> -> vector<32x1xf32>
    %cst_7 = arith.constant 1.000000e+00 : f32
    %26 = vector.broadcast %cst_7 : f32 to vector<32x1xf32>
    %27 = arith.mulf %26, %24 : vector<32x1xf32>
    %28 = vector.broadcast %27 : vector<32x1xf32> to vector<32x128xf32>
    %29 = arith.mulf %28, %5 : vector<32x128xf32>
    %30 = vector.broadcast %25 : vector<32x1xf32> to vector<32x128xf32>
    %31 = arith.mulf %29, %30 : vector<32x128xf32>
    %cst_8 = arith.constant 0.000000e+00 : f32
    %32 = vector.broadcast %cst_8 : f32 to vector<32x128xf32>
    %33 = arith.select %3, %31, %32 : vector<32x128xi1>, vector<32x128xf32>
    %34 = arith.truncf %33 : vector<32x128xf32> to vector<32x128xbf16>
    %c0_9 = arith.constant 0 : index
    %c0_10 = arith.constant 0 : index
    %35 = vector.load %arg2[%c0_9, %c0_10] : memref<32x128xbf16, #tpu.memory_space<vmem>>, vector<32x128xbf16>
    tpu.vector_store %arg2[%c0_9, %c0_10], %34 {strides = array<i32>} : memref<32x128xbf16, #tpu.memory_space<vmem>>, vector<32x128xbf16>,
    return
  }
  func.func @transform_0(%arg0: i32) -> (i32, i32) {
    %c0_i32 = arith.constant 0 : i32
    %c0_i32_0 = arith.constant 0 : i32
    return %arg0, %c0_i32 : i32, i32
  }
  func.func @transform_1(%arg0: i32) -> (i32, i32) {
    %c0_i32 = arith.constant 0 : i32
    %c0_i32_0 = arith.constant 0 : i32
    return %arg0, %c0_i32 : i32, i32
  }
}

module attributes {stable_mosaic.version = 11 : i64} {
  func.func @_fused_layer_kernel(%arg0: i32, %arg1: i32, %arg2: memref<32x32xbf16, #tpu.memory_space<vmem>>, %arg3: memref<32x128xbf16, #tpu.memory_space<vmem>>, %arg4: memref<32x128xbf16, #tpu.memory_space<vmem>>, %arg5: memref<32x128xf32, #tpu.memory_space<vmem>>) attributes {dimension_semantics = [#tpu.dimension_semantics<parallel>, #tpu.dimension_semantics<arbitrary>], iteration_bounds = array<i64: 1, 1>, scalar_prefetch = 0 : i64, scratch_operands = 1 : i64, tpu.core_type = #tpu.core_type<tc>, window_params = [{transform_indices = @transform_0, window_bounds = array<i64: 32, 32>}, {transform_indices = @transform_1, window_bounds = array<i64: 32, 128>}, {transform_indices = @transform_2, window_bounds = array<i64: 32, 128>}]} {
    %c0_i32 = arith.constant 0 : i32
    %0 = arith.cmpi eq, %arg1, %c0_i32 : i32
    %1 = arith.extui %0 : i1 to i32
    %c0_i32_0 = arith.constant 0 : i32
    %2 = arith.cmpi ne, %1, %c0_i32_0 : i32
    scf.if %2 {
      %cst_10 = arith.constant 0.000000e+00 : f32
      %12 = vector.broadcast %cst_10 : f32 to vector<32x128xf32>
      %c0_11 = arith.constant 0 : index
      %c0_12 = arith.constant 0 : index
      %13 = vector.load %arg5[%c0_11, %c0_12] : memref<32x128xf32, #tpu.memory_space<vmem>>, vector<32x128xf32>
      tpu.vector_store %arg5[%c0_11, %c0_12], %12 {strides = array<i32>} : memref<32x128xf32, #tpu.memory_space<vmem>>, vector<32x128xf32>,
    } else {
    }
    %c0 = arith.constant 0 : index
    %c0_1 = arith.constant 0 : index
    %3 = vector.load %arg5[%c0, %c0_1] : memref<32x128xf32, #tpu.memory_space<vmem>>, vector<32x128xf32>
    %c0_2 = arith.constant 0 : index
    %c0_3 = arith.constant 0 : index
    %4 = vector.load %arg2[%c0_2, %c0_3] : memref<32x32xbf16, #tpu.memory_space<vmem>>, vector<32x32xbf16>
    %c0_4 = arith.constant 0 : index
    %c0_5 = arith.constant 0 : index
    %5 = vector.load %arg3[%c0_4, %c0_5] : memref<32x128xbf16, #tpu.memory_space<vmem>>, vector<32x128xbf16>
    %cst = arith.constant dense<0.000000e+00> : vector<32x128xf32>
    %6 = tpu.matmul %4, %5, %cst {dimension_numbers = #tpu.dot_dimension_numbers<[1], [0], [0], [1], [0, 0, 1, 1], [], []>} : vector<32x32xbf16>, vector<32x128xbf16>, vector<32x128xf32> -> vector<32x128xf32>
    %7 = arith.addf %3, %6 : vector<32x128xf32>
    %c0_6 = arith.constant 0 : index
    %c0_7 = arith.constant 0 : index
    %8 = vector.load %arg5[%c0_6, %c0_7] : memref<32x128xf32, #tpu.memory_space<vmem>>, vector<32x128xf32>
    tpu.vector_store %arg5[%c0_6, %c0_7], %7 {strides = array<i32>} : memref<32x128xf32, #tpu.memory_space<vmem>>, vector<32x128xf32>,
    %c0_i32_8 = arith.constant 0 : i32
    %9 = arith.cmpi eq, %arg1, %c0_i32_8 : i32
    %10 = arith.extui %9 : i1 to i32
    %c0_i32_9 = arith.constant 0 : i32
    %11 = arith.cmpi ne, %10, %c0_i32_9 : i32
    scf.if %11 {
      %c0_10 = arith.constant 0 : index
      %c0_11 = arith.constant 0 : index
      %12 = vector.load %arg5[%c0_10, %c0_11] : memref<32x128xf32, #tpu.memory_space<vmem>>, vector<32x128xf32>
      %13 = arith.truncf %12 : vector<32x128xf32> to vector<32x128xbf16>
      %c0_12 = arith.constant 0 : index
      %c0_13 = arith.constant 0 : index
      %14 = vector.load %arg4[%c0_12, %c0_13] : memref<32x128xbf16, #tpu.memory_space<vmem>>, vector<32x128xbf16>
      tpu.vector_store %arg4[%c0_12, %c0_13], %13 {strides = array<i32>} : memref<32x128xbf16, #tpu.memory_space<vmem>>, vector<32x128xbf16>,
    } else {
    }
    return
  }
  func.func @transform_0(%arg0: i32, %arg1: i32) -> (i32, i32) {
    %c0_i32 = arith.constant 0 : i32
    return %arg0, %arg1 : i32, i32
  }
  func.func @transform_1(%arg0: i32, %arg1: i32) -> (i32, i32) {
    %c0_i32 = arith.constant 0 : i32
    %c0_i32_0 = arith.constant 0 : i32
    return %arg1, %c0_i32 : i32, i32
  }
  func.func @transform_2(%arg0: i32, %arg1: i32) -> (i32, i32) {
    %c0_i32 = arith.constant 0 : i32
    %c0_i32_0 = arith.constant 0 : i32
    return %arg0, %c0_i32 : i32, i32
  }
}

module attributes {stable_mosaic.version = 11 : i64} {
  func.func @_fused_layer_kernel(%arg0: i32, %arg1: i32, %arg2: memref<32x32xbf16, #tpu.memory_space<vmem>>, %arg3: memref<32x128xbf16, #tpu.memory_space<vmem>>, %arg4: memref<32x128xbf16, #tpu.memory_space<vmem>>, %arg5: memref<32x128xf32, #tpu.memory_space<vmem>>, %arg6: memref<32x128xf32, #tpu.memory_space<vmem>>) attributes {dimension_semantics = [#tpu.dimension_semantics<parallel>, #tpu.dimension_semantics<arbitrary>], iteration_bounds = array<i64: 1, 1>, scalar_prefetch = 0 : i64, scratch_operands = 1 : i64, tpu.core_type = #tpu.core_type<tc>, window_params = [{transform_indices = @transform_0, window_bounds = array<i64: 32, 32>}, {transform_indices = @transform_1, window_bounds = array<i64: 32, 128>}, {transform_indices = @transform_2, window_bounds = array<i64: 32, 128>}, {transform_indices = @transform_3, window_bounds = array<i64: 32, 128>}]} {
    %c0_i32 = arith.constant 0 : i32
    %0 = arith.cmpi eq, %arg1, %c0_i32 : i32
    %1 = arith.extui %0 : i1 to i32
    %c0_i32_0 = arith.constant 0 : i32
    %2 = arith.cmpi ne, %1, %c0_i32_0 : i32
    scf.if %2 {
      %cst_10 = arith.constant 0.000000e+00 : f32
      %12 = vector.broadcast %cst_10 : f32 to vector<32x128xf32>
      %c0_11 = arith.constant 0 : index
      %c0_12 = arith.constant 0 : index
      %13 = vector.load %arg6[%c0_11, %c0_12] : memref<32x128xf32, #tpu.memory_space<vmem>>, vector<32x128xf32>
      tpu.vector_store %arg6[%c0_11, %c0_12], %12 {strides = array<i32>} : memref<32x128xf32, #tpu.memory_space<vmem>>, vector<32x128xf32>,
    } else {
    }
    %c0 = arith.constant 0 : index
    %c0_1 = arith.constant 0 : index
    %3 = vector.load %arg6[%c0, %c0_1] : memref<32x128xf32, #tpu.memory_space<vmem>>, vector<32x128xf32>
    %c0_2 = arith.constant 0 : index
    %c0_3 = arith.constant 0 : index
    %4 = vector.load %arg2[%c0_2, %c0_3] : memref<32x32xbf16, #tpu.memory_space<vmem>>, vector<32x32xbf16>
    %c0_4 = arith.constant 0 : index
    %c0_5 = arith.constant 0 : index
    %5 = vector.load %arg3[%c0_4, %c0_5] : memref<32x128xbf16, #tpu.memory_space<vmem>>, vector<32x128xbf16>
    %cst = arith.constant dense<0.000000e+00> : vector<32x128xf32>
    %6 = tpu.matmul %4, %5, %cst {dimension_numbers = #tpu.dot_dimension_numbers<[1], [0], [0], [1], [0, 0, 1, 1], [], []>} : vector<32x32xbf16>, vector<32x128xbf16>, vector<32x128xf32> -> vector<32x128xf32>
    %7 = arith.addf %3, %6 : vector<32x128xf32>
    %c0_6 = arith.constant 0 : index
    %c0_7 = arith.constant 0 : index
    %8 = vector.load %arg6[%c0_6, %c0_7] : memref<32x128xf32, #tpu.memory_space<vmem>>, vector<32x128xf32>
    tpu.vector_store %arg6[%c0_6, %c0_7], %7 {strides = array<i32>} : memref<32x128xf32, #tpu.memory_space<vmem>>, vector<32x128xf32>,
    %c0_i32_8 = arith.constant 0 : i32
    %9 = arith.cmpi eq, %arg1, %c0_i32_8 : i32
    %10 = arith.extui %9 : i1 to i32
    %c0_i32_9 = arith.constant 0 : i32
    %11 = arith.cmpi ne, %10, %c0_i32_9 : i32
    scf.if %11 {
      %c0_10 = arith.constant 0 : index
      %c0_11 = arith.constant 0 : index
      %12 = vector.load %arg6[%c0_10, %c0_11] : memref<32x128xf32, #tpu.memory_space<vmem>>, vector<32x128xf32>
      %c0_12 = arith.constant 0 : index
      %c0_13 = arith.constant 0 : index
      %13 = vector.load %arg4[%c0_12, %c0_13] : memref<32x128xbf16, #tpu.memory_space<vmem>>, vector<32x128xbf16>
      %14 = arith.extf %13 : vector<32x128xbf16> to vector<32x128xf32>
      %15 = arith.addf %12, %14 : vector<32x128xf32>
      %16 = tpu.iota {dimensions = array<i32: 1>} : vector<32x128xi32>
      %c0_i32_14 = arith.constant 0 : i32
      %17 = vector.broadcast %c0_i32_14 : i32 to vector<32x128xi32>
      %18 = arith.cmpi sgt, %16, %17 : vector<32x128xi32>
      %cst_15 = arith.constant 0.000000e+00 : f32
      %19 = vector.broadcast %cst_15 : f32 to vector<32x128xf32>
      %20 = arith.select %18, %15, %19 : vector<32x128xi1>, vector<32x128xf32>
      %21 = arith.mulf %20, %20 : vector<32x128xf32>
      %cst_16 = arith.constant dense<0.000000e+00> : vector<32xf32>
      %22 = vector.multi_reduction <add>, %21, %cst_16 [1] : vector<32x128xf32> to vector<32xf32>
      %23 = vector.shape_cast %22 : vector<32xf32> to vector<32x1xf32>
      %24 = math.sqrt %23 : vector<32x1xf32>
      %cst_17 = arith.constant 1.000000e-15 : f32
      %25 = vector.broadcast %cst_17 : f32 to vector<32x1xf32>
      %26 = arith.maximumf %24, %25 : vector<32x1xf32>
      %cst_18 = arith.constant 1.000000e+00 : f32
      %27 = vector.broadcast %cst_18 : f32 to vector<32x1xf32>
      %28 = arith.divf %26, %27 : vector<32x1xf32>
      %cst_19 = arith.constant -1.500000e+01 : f32
      %cst_20 = arith.constant 1.500000e+01 : f32
      %29 = vector.broadcast %cst_19 : f32 to vector<32x1xf32>
      %30 = arith.maximumf %29, %28 : vector<32x1xf32>
      %31 = vector.broadcast %cst_20 : f32 to vector<32x1xf32>
      %32 = arith.minimumf %31, %30 : vector<32x1xf32>
      %33 = math.exp %32 : vector<32x1xf32>
      %cst_21 = arith.constant 0.000000e+00 : f32
      %34 = vector.broadcast %cst_21 : f32 to vector<32x1xf32>
      %35 = arith.subf %34, %32 : vector<32x1xf32>
      %36 = math.exp %35 : vector<32x1xf32>
      %37 = arith.subf %33, %36 : vector<32x1xf32>
      %cst_22 = arith.constant 5.000000e-01 : f32
      %38 = vector.broadcast %cst_22 : f32 to vector<32x1xf32>
      %39 = arith.mulf %38, %37 : vector<32x1xf32>
      %cst_23 = arith.constant 1.000000e+00 : f32
      %40 = vector.broadcast %cst_23 : f32 to vector<32x1xf32>
      %41 = arith.mulf %40, %39 : vector<32x1xf32>
      %42 = vector.broadcast %41 : vector<32x1xf32> to vector<32x128xf32>
      %43 = arith.mulf %42, %20 : vector<32x128xf32>
      %44 = tpu.reciprocal %26 {approx = true} : vector<32x1xf32> -> vector<32x1xf32>
      %45 = vector.broadcast %44 : vector<32x1xf32> to vector<32x128xf32>
      %46 = arith.mulf %43, %45 : vector<32x128xf32>
      %47 = arith.mulf %46, %46 : vector<32x128xf32>
      %cst_24 = arith.constant dense<0.000000e+00> : vector<32xf32>
      %48 = vector.multi_reduction <add>, %47, %cst_24 [1] : vector<32x128xf32> to vector<32xf32>
      %49 = vector.shape_cast %48 : vector<32xf32> to vector<32x1xf32>
      %cst_25 = arith.constant 1.000000e+00 : f32
      %50 = vector.broadcast %cst_25 : f32 to vector<32x1xf32>
      %51 = arith.addf %50, %49 : vector<32x1xf32>
      %cst_26 = arith.constant 1.000000e-07 : f32
      %52 = vector.broadcast %cst_26 : f32 to vector<32x1xf32>
      %53 = arith.maximumf %51, %52 : vector<32x1xf32>
      %54 = math.sqrt %53 : vector<32x1xf32>
      %55 = vector.shape_cast %54 : vector<32x1xf32> to vector<32x1xf32>
      %56 = vector.broadcast %55 : vector<32x1xf32> to vector<32x128xf32>
      %57 = arith.select %18, %46, %56 : vector<32x128xi1>, vector<32x128xf32>
      %c0_27 = arith.constant 0 : index
      %c0_28 = arith.constant 0 : index
      %58 = vector.load %arg5[%c0_27, %c0_28] : memref<32x128xf32, #tpu.memory_space<vmem>>, vector<32x128xf32>
      tpu.vector_store %arg5[%c0_27, %c0_28], %57 {strides = array<i32>} : memref<32x128xf32, #tpu.memory_space<vmem>>, vector<32x128xf32>,
    } else {
    }
    return
  }
  func.func @transform_0(%arg0: i32, %arg1: i32) -> (i32, i32) {
    %c0_i32 = arith.constant 0 : i32
    return %arg0, %arg1 : i32, i32
  }
  func.func @transform_1(%arg0: i32, %arg1: i32) -> (i32, i32) {
    %c0_i32 = arith.constant 0 : i32
    %c0_i32_0 = arith.constant 0 : i32
    return %arg1, %c0_i32 : i32, i32
  }
  func.func @transform_2(%arg0: i32, %arg1: i32) -> (i32, i32) {
    %c0_i32 = arith.constant 0 : i32
    %c0_i32_0 = arith.constant 0 : i32
    return %arg0, %c0_i32 : i32, i32
  }
  func.func @transform_3(%arg0: i32, %arg1: i32) -> (i32, i32) {
    %c0_i32 = arith.constant 0 : i32
    %c0_i32_0 = arith.constant 0 : i32
    return %arg0, %c0_i32 : i32, i32
  }
}

</mosaic_0001>

<bundles_post_ra>
// kernel: hyp_agg_forward.3
= control target key start
LH: loop header
LB: loop body
LE: loop exit
PB: predicated region body
PF: predicated region fallthrough
CT: control target
= control target key end

     0   :  { %v12_v0 = vlaneseq  ;;  %v258_v8 = vmov 0   ;;  %s359_s0 = inlined_call_operand.vmem [shape: f32[32,128], index: 0, kind: input, shape index: {}]   ;;  %s360_s1 = inlined_call_operand.vmem [shape: bf16[32,128], index: 1, kind: output, shape index: {}]  }
   0x1   :  { %v10_v1 = vld [vmem:[%s359_s0 + $0x10] sm:$0xff]  ;;  %v8_v2 = vld [vmem:[%s359_s0] sm:$0xff]  ;;  %v11_v3 = vld [vmem:[%s359_s0 + $0x18] sm:$0xff]  ;;  %224 = vset.pattern.permute.xlu0 %v258_v8  ;;  %225 = vset.pattern.permute.xlu1 %v258_v8 }
   0x2   :  { %v278_v4 = vand.u32 127, %v12_v0  ;;  %v280_v5 = vmax.f32 %v10_v1, 1.0000001  ;;  %v282_v6 = vmax.f32 %v8_v2, 1.0000001  ;;  %v9_v7 = vld [vmem:[%s359_s0 + $0x8] sm:$0xff]  ;;  %223 = vset.pattern.permute.xlu2 %v258_v8 }
   0x3   :  { %v287_v9 = vmax.f32 %v11_v3, 1.0000001  ;;  %v289_v10 = vmax.f32 %v9_v7, 1.0000001 }
   0x4   :  { %vm14_vm0 = vcmp.gt.s32.totalorder %v278_v4, 0  ;;  %v89_v11 = vmul.f32 %v280_v5, %v280_v5  ;;  %v87_v12 = vmul.f32 %v282_v6, %v282_v6 }
   0x5   :  { %v298_v13 = vsel %vm14_vm0, %v10_v1, 0.0  ;;  %v302_v14 = vsel %vm14_vm0, %v8_v2, 0.0  ;;  %v90_v15 = vmul.f32 %v287_v9, %v287_v9  ;;  %v88_v21 = vmul.f32 %v289_v10, %v289_v10 }
   0x6   :  { %v21_v16 = vmul.f32 %v298_v13, %v298_v13  ;;  %v209_v17 = vadd.f32 -1.0, %v89_v11  ;;  %v19_v18 = vmul.f32 %v302_v14, %v302_v14  ;;  %v207_v19 = vadd.f32 -1.0, %v87_v12 }
   0x7   :  { %v210_v20 = vadd.f32 -1.0, %v90_v15  ;;  %v316_v24 = vsel %vm14_vm0, %v11_v3, 0.0  ;;  %v320_v26 = vsel %vm14_vm0, %v9_v7, 0.0  ;;  %v208_v27 = vadd.f32 -1.0, %v88_v21 }
   0x8   :  { %v97_v22 = vmax.f32 %v209_v17, 1e-07  ;;  %27 = vadd.xlane.f32.xlu1 %v21_v16  ;;  %v312_v23 = vmax.f32 %v207_v19, 1e-07  ;;  %23 = vadd.xlane.f32.xlu0 %v19_v18  ;;  %v22_v29 = vmul.f32 %v316_v24, %v316_v24  ;;  %v20_v30 = vmul.f32 %v320_v26, %v320_v26 }
   0x9   :  { %v98_v25 = vmax.f32 %v210_v20, 1e-07  ;;  %v96_v28 = vmax.f32 %v208_v27, 1e-07 }
   0xa   :  { %226 = vrsqrt.f32 %v97_v22  ;;  %vm130_vm1 = vcmp.eq.f32.partialorder %v97_v22, inf  ;;  %vm132_vm2 = vcmp.eq.f32.partialorder %v97_v22, 0.0  ;;  %v133_v50 = vand.u32 2147483648, %v97_v22 }
   0xb   :  { %228 = vrsqrt.f32 %v98_v25  ;;  %vm142_vm3 = vcmp.eq.f32.partialorder %v98_v25, inf  ;;  %vm144_vm4 = vcmp.eq.f32.partialorder %v98_v25, 0.0  ;;  %v145_v55 = vand.u32 2147483648, %v98_v25 }
   0xc   :  { %230 = vrsqrt.f32 %v312_v23  ;;  %vm106_vm5 = vcmp.eq.f32.partialorder %v312_v23, inf  ;;  %vm108_vm6 = vcmp.eq.f32.partialorder %v312_v23, 0.0  ;;  %v109_v58 = vand.u32 2147483648, %v312_v23 }
   0xd   :  { %232 = vrsqrt.f32 %v96_v28  ;;  %vm118_vm7 = vcmp.eq.f32.partialorder %v96_v28, inf  ;;  %v121_v62 = vand.u32 2147483648, %v96_v28  ;;  %vm120_vm8 = vcmp.eq.f32.partialorder %v96_v28, 0.0 }
  0x10   :  { %v227_v31 = vpop.eup %226  ;;  %29 = vadd.xlane.f32.xlu1 %v22_v29  ;;  %25 = vadd.xlane.f32.xlu0 %v20_v30 }
  0x11   :  { %v229_v32 = vpop.eup %228  ;;  %v124_v33 = vmul.f32 %v227_v31, %v97_v22 }
  0x12   :  { %v231_v34 = vpop.eup %230  ;;  %v136_v35 = vmul.f32 %v229_v32, %v98_v25 }
  0x13   :  { %v233_v36 = vpop.eup %232  ;;  %v125_v37 = vmul.f32 %v227_v31, %v124_v33  ;;  %v100_v38 = vmul.f32 %v231_v34, %v312_v23 }
  0x14   :  { %v137_v39 = vmul.f32 %v229_v32, %v136_v35  ;;  %v112_v40 = vmul.f32 %v233_v36, %v96_v28 }
  0x15   :  { %v126_v41 = vmul.f32 0.5, %v125_v37  ;;  %v101_v42 = vmul.f32 %v231_v34, %v100_v38 }
  0x16   :  { %v138_v43 = vmul.f32 0.5, %v137_v39  ;;  %v113_v44 = vmul.f32 %v233_v36, %v112_v40 }
  0x17   :  { %v127_v45 = vsub.f32 1.5, %v126_v41  ;;  %v102_v46 = vmul.f32 0.5, %v101_v42 }
  0x18   :  { %v139_v47 = vsub.f32 1.5, %v138_v43  ;;  %v114_v48 = vmul.f32 0.5, %v113_v44 }
  0x19   :  { %v128_v49 = vmul.f32 %v227_v31, %v127_v45  ;;  %v103_v51 = vsub.f32 1.5, %v102_v46 }
  0x1a   :  { %v140_v52 = vmul.f32 %v229_v32, %v139_v47  ;;  %v115_v53 = vsub.f32 1.5, %v114_v48 }
  0x1b   :  { %v129_v54 = vmul.f32 %v128_v49, %v97_v22  ;;  %v104_v56 = vmul.f32 %v231_v34, %v103_v51 }
  0x1c   :  { %v141_v57 = vmul.f32 %v140_v52, %v98_v25  ;;  %v116_v59 = vmul.f32 %v233_v36, %v115_v53 }
  0x1d   :  { %v131_v60 = vsel %vm130_vm1, %v97_v22, %v129_v54  ;;  %v105_v61 = vmul.f32 %v104_v56, %v312_v23 }
  0x1e   :  { %v134_v63 = vsel %vm132_vm2, %v133_v50, %v131_v60  ;;  %v143_v0 = vsel %vm142_vm3, %v98_v25, %v141_v57  ;;  %v117_v1 = vmul.f32 %v116_v59, %v96_v28 }
  0x1f   :  { %v149_v2 = vadd.f32 %v134_v63, %v280_v5  ;;  %v146_v3 = vsel %vm144_vm4, %v145_v55, %v143_v0  ;;  %v107_v7 = vsel %vm106_vm5, %v312_v23, %v105_v61 }
  0x20   :  { %v150_v8 = vadd.f32 %v146_v3, %v287_v9  ;;  %v110_v11 = vsel %vm108_vm6, %v109_v58, %v107_v7  ;;  %v119_v12 = vsel %vm118_vm7, %v96_v28, %v117_v1 }
  0x21   :  { %234 = vlog2.f32 %v149_v2  ;;  %v147_v15 = vadd.f32 %v110_v11, %v282_v6  ;;  %v122_v16 = vsel %vm120_vm8, %v121_v62, %v119_v12 }
  0x22   :  { %236 = vlog2.f32 %v150_v8  ;;  %v148_v17 = vadd.f32 %v122_v16, %v289_v10 }
  0x23   :  { %238 = vlog2.f32 %v147_v15 }
  0x24   :  { %240 = vlog2.f32 %v148_v17 }
  0x27   :  { %v235_v18 = vpop.eup %234 }
  0x28   :  { %v237_v19 = vpop.eup %236  ;;  %v156_v5 = vmul.f32 0.6931472, %v235_v18 }
  0x29   :  { %v239_v20 = vpop.eup %238  ;;  %v158_v21 = vmul.f32 0.6931472, %v237_v19 }
  0x2a   :  { %175 = vperm.xlu0 %224, %v156_v5   ;;  %v152_v22 = vmul.f32 0.6931472, %v239_v20  ;;  %v241_v9 = vpop.eup %240 }
  0x2b   :  { %180 = vperm.xlu1 %225, %v158_v21   ;;  %v154_v23 = vmul.f32 0.6931472, %v241_v9 }
  0x2c   :  { %165 = vperm.xlu2 %223, %v152_v22  }
  0x34   :  { %170 = vperm.xlu2 %223, %v154_v23  }
  0x7b   :  { %v28_v25 = vpop.xlane.xlu1 %27  ;;  %v24_v6 = vpop.xlane.xlu0 %23 }
  0x7c   :  { %242 = vrsqrt.f32 %v28_v25  ;;  %vm62_vm9 = vcmp.eq.f32.partialorder %v28_v25, inf  ;;  %vm38_vm10 = vcmp.eq.f32.partialorder %v24_v6, inf  ;;  %v41_v49 = vand.u32 2147483648, %v24_v6 }
  0x7d   :  { %244 = vrsqrt.f32 %v24_v6  ;;  %vm40_vm11 = vcmp.eq.f32.partialorder %v24_v6, 0.0  ;;  %v65_v53 = vand.u32 2147483648, %v28_v25  ;;  %vm64_vm12 = vcmp.eq.f32.partialorder %v28_v25, 0.0 }
  0x82   :  { %v243_v27 = vpop.eup %242 }
  0x83   :  { %v245_v28 = vpop.eup %244  ;;  %v56_v10 = vmul.f32 %v243_v27, %v28_v25  ;;  %v30_v29 = vpop.xlane.xlu1 %29 }
  0x84   :  { %v26_v30 = vpop.xlane.xlu0 %25  ;;  %v32_v31 = vmul.f32 %v245_v28, %v24_v6  ;;  %246 = vrsqrt.f32 %v30_v29  ;;  %vm74_vm13 = vcmp.eq.f32.partialorder %v30_v29, inf  ;;  %v77_v1 = vand.u32 2147483648, %v30_v29 }
  0x85   :  { %v57_v32 = vmul.f32 %v243_v27, %v56_v10  ;;  %248 = vrsqrt.f32 %v26_v30  ;;  %vm50_vm14 = vcmp.eq.f32.partialorder %v26_v30, inf  ;;  %v53_v2 = vand.u32 2147483648, %v26_v30 }
  0x86   :  { %v33_v33 = vmul.f32 %v245_v28, %v32_v31  ;;  %v166_v60 = vpop.permute.xlu2 %165  ;;  %vm76_vm15 = vcmp.eq.f32.partialorder %v30_v29, 0.0  ;;  %vm52_vm1 = vcmp.eq.f32.partialorder %v26_v30, 0.0 }
  0x87   :  { %v58_v34 = vmul.f32 0.5, %v57_v32  ;;  %v183_v17 = vmul.f32 %v166_v60, %v302_v14 }
  0x88   :  { %v34_v35 = vmul.f32 0.5, %v33_v33 }
  0x89   :  { %v59_v36 = vsub.f32 1.5, %v58_v34 }
  0x8a   :  { %v247_v37 = vpop.eup %246  ;;  %v35_v38 = vsub.f32 1.5, %v34_v35 }
  0x8b   :  { %v249_v39 = vpop.eup %248  ;;  %v60_v40 = vmul.f32 %v243_v27, %v59_v36  ;;  %v68_v41 = vmul.f32 %v247_v37, %v30_v29 }
  0x8c   :  { %v36_v42 = vmul.f32 %v245_v28, %v35_v38  ;;  %v44_v43 = vmul.f32 %v249_v39, %v26_v30 }
  0x8d   :  { %v61_v44 = vmul.f32 %v60_v40, %v28_v25  ;;  %v69_v45 = vmul.f32 %v247_v37, %v68_v41 }
  0x8e   :  { %v37_v46 = vmul.f32 %v36_v42, %v24_v6  ;;  %v45_v47 = vmul.f32 %v249_v39, %v44_v43  ;;  %v171_v20 = vpop.permute.xlu2 %170 }
  0x8f   :  { %v70_v48 = vmul.f32 0.5, %v69_v45  ;;  %v63_v50 = vsel %vm62_vm9, %v28_v25, %v61_v44 }
  0x90   :  { %v46_v51 = vmul.f32 0.5, %v45_v47  ;;  %v39_v52 = vsel %vm38_vm10, %v24_v6, %v37_v46  ;;  %v66_v57 = vsel %vm64_vm12, %v65_v53, %v63_v50  ;;  %v184_v6 = vmul.f32 %v171_v20, %v320_v26 }
  0x91   :  { %v71_v54 = vsub.f32 1.5, %v70_v48  ;;  %v42_v55 = vsel %vm40_vm11, %v41_v49, %v39_v52  ;;  %v81_v63 = vmax.f32 %v66_v57, 1e-15 }
  0x92   :  { %v47_v56 = vsub.f32 1.5, %v46_v51  ;;  %v79_v61 = vmax.f32 %v42_v55, 1e-15 }
  0x93   :  { %v72_v58 = vmul.f32 %v247_v37, %v71_v54 }
  0x94   :  { %v48_v59 = vmul.f32 %v249_v39, %v47_v56  ;;  %250 = vrcp.f32 %v79_v61 }
  0x95   :  { %v73_v62 = vmul.f32 %v72_v58, %v30_v29  ;;  %252 = vrcp.f32 %v81_v63 }
  0x96   :  { %v49_v0 = vmul.f32 %v48_v59, %v26_v30 }
  0x97   :  { %v75_v3 = vsel %vm74_vm13, %v30_v29, %v73_v62 }
  0x98   :  { %v51_v7 = vsel %vm50_vm14, %v26_v30, %v49_v0  ;;  %v78_v8 = vsel %vm76_vm15, %v77_v1, %v75_v3 }
  0x99   :  { %v54_v11 = vsel %vm52_vm1, %v53_v2, %v51_v7  ;;  %v82_v12 = vmax.f32 %v78_v8, 1e-15 }
  0x9a   :  { %v80_v15 = vmax.f32 %v54_v11, 1e-15  ;;  %v251_v5 = vpop.eup %250 }
  0x9b   :  { %254 = vrcp.f32 %v82_v12  ;;  %v253_v22 = vpop.eup %252  ;;  %v187_v25 = vmul.f32 %v251_v5, %v183_v17 }
  0x9c   :  { %256 = vrcp.f32 %v80_v15  ;;  %v176_v16 = vpop.permute.xlu0 %175 }
  0x9d   :  { %v185_v18 = vmul.f32 %v176_v16, %v298_v13  ;;  %v181_v19 = vpop.permute.xlu1 %180  ;;  %v191_v14 = vsel %vm14_vm0, %v187_v25, 0.0 }
  0x9e   :  { %v186_v21 = vmul.f32 %v181_v19, %v316_v24 }
  0x9f   :  { %v189_v9 = vmul.f32 %v253_v22, %v185_v18 }
  0xa1   :  { %v255_v23 = vpop.eup %254  ;;  %v193_v29 = vsel %vm14_vm0, %v189_v9, 0.0 }
  0xa2   :  { %v257_v27 = vpop.eup %256  ;;  %v190_v28 = vmul.f32 %v255_v23, %v186_v21 }
  0xa3   :  { %v188_v10 = vmul.f32 %v257_v27, %v184_v6 }
  0xa4   :  { %v194_v13 = vsel %vm14_vm0, %v190_v28, 0.0 }
  0xa5   :  { %v192_v24 = vsel %vm14_vm0, %v188_v10, 0.0  ;;  %v219_v30 = vpack.c.bf16 %v194_v13, %v193_v29 }
  0xa6   :  { %v214_v31 = vpack.c.bf16 %v192_v24, %v191_v14 }
  0xa7   :  { %221 = vst [vmem:[%s360_s1 + $0x8] sm:$0xff] %v219_v30  }
  0xa8   :  { %215 = vst [vmem:[%s360_s1] sm:$0xff] %v214_v31  }

// kernel: hyp_agg_forward.4
= control target key start
LH: loop header
LB: loop body
LE: loop exit
PB: predicated region body
PF: predicated region fallthrough
CT: control target
= control target key end

     0   :  { %vm54_vm0 = vcmask 261120   ;;  %s175_s1 = inlined_call_operand.vmem [shape: bf16[32,128], index: 1, kind: input, shape index: {}]   ;;  %s176_s0 = inlined_call_operand.vmem [shape: bf16[32,32], index: 0, kind: input, shape index: {}]   ;;  %s177_s2 = inlined_call_operand.vmem [shape: bf16[32,128], index: 2, kind: output, shape index: {}]  }
   0x1   :  { %v128_v0 = vld [vmem:[%s175_s1 + $0x8] sm:$0xff]  ;;  %v127_v1 = vld [vmem:[%s175_s1] sm:$0xff] }
   0x2   :  { %67 = vmatpush.bf16.msra.mxu0 %v128_v0  ;;  %140 = vmatpush.bf16.msra.mxu1 %v128_v0  ;;  %v125_v2 = vld [vmem:[%s176_s0] sm:$0xff]  ;;  %v126_v3 = vld [vmem:[%s176_s0 + $0x8] sm:$0xff] }
   0x6   :  { %68 = vmatpush.bf16.msra.mxu0 %v127_v1  ;;  %141 = vmatpush.bf16.msra.mxu1 %v127_v1 }
   0x9   :  { %123 = vmatmul.msk.bf16.vlgmr.msra.gmra.mxu0 %vm54_vm0, %v125_v2  ;;  %124 = vmatmul.msk.bf16.vlgmr.msra.gmra.mxu1 %vm54_vm0, %v126_v3 }
  0x86   :  { %v70_v4 = vpop.f32.mrf.mxu0  ;;  %v75_v5 = vpop.f32.mrf.mxu1 }
  0x8e   :  { %v72_v6 = vpop.f32.mrf.mxu0  ;;  %v77_v7 = vpop.f32.mrf.mxu1 }
  0x8f   :  { %v132_v8 = vpack.c.bf16 %v72_v6, %v70_v4  ;;  %v137_v9 = vpack.c.bf16 %v77_v7, %v75_v5 }
  0x91   :  { %133 = vst [vmem:[%s177_s2] sm:$0xff] %v132_v8  }
  0x92   :  { %139 = vst [vmem:[%s177_s2 + $0x8] sm:$0xff] %v137_v9  }

// kernel: hyp_agg_forward.5
= control target key start
LH: loop header
LB: loop body
LE: loop exit
PB: predicated region body
PF: predicated region fallthrough
CT: control target
= control target key end

     0   :  { %vm57_vm0 = vcmask 261120   ;;  %v110_v4 = vlaneseq  ;;  %s507_s1 = inlined_call_operand.vmem [shape: bf16[32,128], index: 1, kind: input, shape index: {}, may-alias: {1,2}]   ;;  %s508_s0 = inlined_call_operand.vmem [shape: bf16[32,32], index: 0, kind: input, shape index: {}]   ;;  %s509_s2 = inlined_call_operand.vmem [shape: bf16[32,128], index: 2, kind: input, shape index: {}, may-alias: {1,2}]   ;;  %s510_s3 = inlined_call_operand.vmem [shape: f32[32,128], index: 3, kind: output, shape index: {}]  }
   0x1   :  { %v334_v0 = vld [vmem:[%s507_s1 + $0x8] sm:$0xff]  ;;  %v333_v1 = vld [vmem:[%s507_s1] sm:$0xff] }
   0x2   :  { %70 = vmatpush.bf16.msra.mxu0 %v334_v0  ;;  %344 = vmatpush.bf16.msra.mxu1 %v334_v0  ;;  %v331_v2 = vld [vmem:[%s508_s0] sm:$0xff]  ;;  %v332_v3 = vld [vmem:[%s508_s0 + $0x8] sm:$0xff]  ;;  %v424_v7 = vand.u32 127, %v110_v4 }
   0x3   :  { %v336_v5 = vld [vmem:[%s509_s2] sm:$0xff]   ;;  %v343_v6 = vld [vmem:[%s509_s2 + $0x8] sm:$0xff]  }
   0x4   :  { %v337_v8 = vunpack.c.l.bf16 %v336_v5  ;;  %v341_v9 = vunpack.c.l.bf16 %v343_v6  ;;  %vm112_vm1 = vcmp.gt.s32.totalorder %v424_v7, 0  ;;  %v338_v18 = vunpack.c.h.bf16 %v336_v5 }
   0x5   :  { %v342_v19 = vunpack.c.h.bf16 %v343_v6 }
   0x6   :  { %71 = vmatpush.bf16.msra.mxu0 %v333_v1  ;;  %345 = vmatpush.bf16.msra.mxu1 %v333_v1 }
   0x9   :  { %325 = vmatmul.msk.bf16.vlgmr.msra.gmra.mxu0 %vm57_vm0, %v331_v2  ;;  %326 = vmatmul.msk.bf16.vlgmr.msra.gmra.mxu1 %vm57_vm0, %v332_v3 }
  0x86   :  { %v73_v10 = vpop.f32.mrf.mxu0  ;;  %v78_v11 = vpop.f32.mrf.mxu1 }
  0x87   :  { %v106_v12 = vadd.f32 %v337_v8, %v73_v10  ;;  %v108_v13 = vadd.f32 %v341_v9, %v78_v11 }
  0x89   :  { %v429_v14 = vsel %vm112_vm1, %v108_v13, 0.0  ;;  %v433_v15 = vsel %vm112_vm1, %v106_v12, 0.0 }
  0x8a   :  { %v119_v16 = vmul.f32 %v429_v14, %v429_v14  ;;  %v117_v17 = vmul.f32 %v433_v15, %v433_v15 }
  0x8c   :  { %125 = vadd.xlane.f32.xlu1 %v119_v16  ;;  %121 = vadd.xlane.f32.xlu0 %v117_v17 }
  0x8e   :  { %v75_v20 = vpop.f32.mrf.mxu0  ;;  %v80_v21 = vpop.f32.mrf.mxu1 }
  0x8f   :  { %v107_v22 = vadd.f32 %v338_v18, %v75_v20  ;;  %v109_v23 = vadd.f32 %v342_v19, %v80_v21 }
  0x91   :  { %v441_v24 = vsel %vm112_vm1, %v109_v23, 0.0  ;;  %v445_v25 = vsel %vm112_vm1, %v107_v22, 0.0 }
  0x92   :  { %v120_v26 = vmul.f32 %v441_v24, %v441_v24  ;;  %v118_v27 = vmul.f32 %v445_v25, %v445_v25 }
  0x94   :  { %127 = vadd.xlane.f32.xlu1 %v120_v26  ;;  %123 = vadd.xlane.f32.xlu0 %v118_v27 }
  0xff   :  { %v126_v28 = vpop.xlane.xlu1 %125  ;;  %v122_v29 = vpop.xlane.xlu0 %121 }
 0x100   :  { %346 = vrsqrt.f32 %v126_v28  ;;  %vm160_vm2 = vcmp.eq.f32.partialorder %v126_v28, inf  ;;  %v163_v50 = vand.u32 2147483648, %v126_v28  ;;  %vm136_vm3 = vcmp.eq.f32.partialorder %v122_v29, inf }
 0x101   :  { %348 = vrsqrt.f32 %v122_v29  ;;  %v139_v53 = vand.u32 2147483648, %v122_v29  ;;  %vm162_vm4 = vcmp.eq.f32.partialorder %v126_v28, 0.0  ;;  %vm138_vm5 = vcmp.eq.f32.partialorder %v122_v29, 0.0 }
 0x106   :  { %v347_v30 = vpop.eup %346 }
 0x107   :  { %v349_v31 = vpop.eup %348  ;;  %v154_v32 = vmul.f32 %v347_v30, %v126_v28  ;;  %v128_v33 = vpop.xlane.xlu1 %127 }
 0x108   :  { %v451_v34 = vpop.xlane.xlu0 %123  ;;  %v130_v35 = vmul.f32 %v349_v31, %v122_v29  ;;  %350 = vrsqrt.f32 %v128_v33  ;;  %vm172_vm6 = vcmp.eq.f32.partialorder %v128_v33, inf  ;;  %v175_v2 = vand.u32 2147483648, %v128_v33 }
 0x109   :  { %v155_v36 = vmul.f32 %v347_v30, %v154_v32  ;;  %352 = vrsqrt.f32 %v451_v34  ;;  %vm148_vm7 = vcmp.eq.f32.partialorder %v451_v34, inf  ;;  %v151_v6 = vand.u32 2147483648, %v451_v34 }
 0x10a   :  { %v131_v37 = vmul.f32 %v349_v31, %v130_v35  ;;  %vm174_vm8 = vcmp.eq.f32.partialorder %v128_v33, 0.0  ;;  %vm150_vm9 = vcmp.eq.f32.partialorder %v451_v34, 0.0 }
 0x10b   :  { %v156_v38 = vmul.f32 0.5, %v155_v36 }
 0x10c   :  { %v132_v39 = vmul.f32 0.5, %v131_v37 }
 0x10d   :  { %v157_v40 = vsub.f32 1.5, %v156_v38 }
 0x10e   :  { %v351_v41 = vpop.eup %350  ;;  %v133_v42 = vsub.f32 1.5, %v132_v39 }
 0x10f   :  { %v353_v43 = vpop.eup %352  ;;  %v158_v44 = vmul.f32 %v347_v30, %v157_v40  ;;  %v166_v45 = vmul.f32 %v351_v41, %v128_v33 }
 0x110   :  { %v134_v46 = vmul.f32 %v349_v31, %v133_v42  ;;  %v142_v47 = vmul.f32 %v353_v43, %v451_v34 }
 0x111   :  { %v159_v48 = vmul.f32 %v158_v44, %v126_v28  ;;  %v167_v49 = vmul.f32 %v351_v41, %v166_v45 }
 0x112   :  { %v135_v51 = vmul.f32 %v134_v46, %v122_v29  ;;  %v143_v52 = vmul.f32 %v353_v43, %v142_v47 }
 0x113   :  { %v168_v54 = vmul.f32 0.5, %v167_v49  ;;  %v161_v55 = vsel %vm160_vm2, %v126_v28, %v159_v48 }
 0x114   :  { %v144_v56 = vmul.f32 0.5, %v143_v52  ;;  %v137_v57 = vsel %vm136_vm3, %v122_v29, %v135_v51  ;;  %v164_v58 = vsel %vm162_vm4, %v163_v50, %v161_v55 }
 0x115   :  { %v169_v59 = vsub.f32 1.5, %v168_v54  ;;  %v140_v60 = vsel %vm138_vm5, %v139_v53, %v137_v57  ;;  %v179_v61 = vmax.f32 %v164_v58, 1e-15 }
 0x116   :  { %v145_v62 = vsub.f32 1.5, %v144_v56  ;;  %v177_v63 = vmax.f32 %v140_v60, 1e-15 }
 0x117   :  { %v170_v0 = vmul.f32 %v351_v41, %v169_v59  ;;  %v329_v1 = vclamps-f32 %v179_v61, 15.0 }
 0x118   :  { %v146_v3 = vmul.f32 %v353_v43, %v145_v62  ;;  %v327_v4 = vclamps-f32 %v177_v63, 15.0 }
 0x119   :  { %v171_v5 = vmul.f32 %v170_v0, %v128_v33  ;;  %v193_v8 = vmul.f32 1.442695, %v329_v1  ;;  %v199_v9 = vsub.f32 0.0, %v329_v1 }
 0x11a   :  { %v147_v10 = vmul.f32 %v146_v3, %v451_v34  ;;  %v189_v11 = vmul.f32 1.442695, %v327_v4  ;;  %v197_v12 = vsub.f32 0.0, %v327_v4 }
 0x11b   :  { %354 = vpow2.f32 %v193_v8  ;;  %v205_v13 = vmul.f32 1.442695, %v199_v9  ;;  %v173_v16 = vsel %vm172_vm6, %v128_v33, %v171_v5 }
 0x11c   :  { %356 = vpow2.f32 %v189_v11  ;;  %v201_v17 = vmul.f32 1.442695, %v197_v12  ;;  %v176_v18 = vsel %vm174_vm8, %v175_v2, %v173_v16  ;;  %v149_v19 = vsel %vm148_vm7, %v451_v34, %v147_v10 }
 0x11d   :  { %358 = vpow2.f32 %v205_v13  ;;  %v180_v20 = vmax.f32 %v176_v18, 1e-15  ;;  %v152_v21 = vsel %vm150_vm9, %v151_v6, %v149_v19 }
 0x11e   :  { %360 = vpow2.f32 %v201_v17  ;;  %v178_v22 = vmax.f32 %v152_v21, 1e-15 }
 0x11f   :  { %v330_v23 = vclamps-f32 %v180_v20, 15.0  ;;  %362 = vrcp.f32 %v179_v61 }
 0x120   :  { %v328_v26 = vclamps-f32 %v178_v22, 15.0  ;;  %364 = vrcp.f32 %v177_v63 }
 0x121   :  { %v355_v27 = vpop.eup %354  ;;  %v195_v28 = vmul.f32 1.442695, %v330_v23  ;;  %v200_v29 = vsub.f32 0.0, %v330_v23 }
 0x122   :  { %v357_v30 = vpop.eup %356  ;;  %v191_v31 = vmul.f32 1.442695, %v328_v26  ;;  %v198_v32 = vsub.f32 0.0, %v328_v26 }
 0x123   :  { %v359_v33 = vpop.eup %358  ;;  %366 = vpow2.f32 %v195_v28  ;;  %v207_v35 = vmul.f32 1.442695, %v200_v29 }
 0x124   :  { %v361_v36 = vpop.eup %360  ;;  %v211_v34 = vsub.f32 %v355_v27, %v359_v33  ;;  %368 = vpow2.f32 %v191_v31  ;;  %v203_v37 = vmul.f32 1.442695, %v198_v32 }
 0x125   :  { %v209_v38 = vsub.f32 %v357_v30, %v361_v36  ;;  %370 = vpow2.f32 %v207_v35  ;;  %v363_v40 = vpop.eup %362 }
 0x126   :  { %v215_v39 = vmul.f32 0.5, %v211_v34  ;;  %372 = vpow2.f32 %v203_v37  ;;  %v365_v42 = vpop.eup %364 }
 0x127   :  { %v213_v41 = vmul.f32 0.5, %v209_v38  ;;  %374 = vrcp.f32 %v180_v20 }
 0x128   :  { %v219_v43 = vmul.f32 %v215_v39, %v429_v14  ;;  %376 = vrcp.f32 %v178_v22 }
 0x129   :  { %v367_v44 = vpop.eup %366  ;;  %v217_v45 = vmul.f32 %v213_v41, %v433_v15 }
 0x12a   :  { %v369_v46 = vpop.eup %368  ;;  %v465_v47 = vmul.f32 %v363_v40, %v219_v43 }
 0x12b   :  { %v371_v48 = vpop.eup %370  ;;  %v467_v49 = vmul.f32 %v365_v42, %v217_v45 }
 0x12c   :  { %v373_v50 = vpop.eup %372  ;;  %v231_v51 = vmul.f32 %v465_v47, %v465_v47  ;;  %v212_v52 = vsub.f32 %v367_v44, %v371_v48 }
 0x12d   :  { %v229_v53 = vmul.f32 %v467_v49, %v467_v49  ;;  %v210_v14 = vsub.f32 %v369_v46, %v373_v50  ;;  %v375_v56 = vpop.eup %374 }
 0x12e   :  { %237 = vadd.xlane.f32.xlu0 %v231_v51  ;;  %v216_v54 = vmul.f32 0.5, %v212_v52  ;;  %v377_v58 = vpop.eup %376 }
 0x12f   :  { %233 = vadd.xlane.f32.xlu2 %v229_v53  ;;  %v214_v15 = vmul.f32 0.5, %v210_v14 }
 0x130   :  { %v220_v55 = vmul.f32 %v216_v54, %v441_v24 }
 0x131   :  { %v218_v57 = vmul.f32 %v214_v15, %v445_v25 }
 0x132   :  { %v475_v59 = vmul.f32 %v375_v56, %v220_v55 }
 0x133   :  { %v477_v60 = vmul.f32 %v377_v58, %v218_v57 }
 0x134   :  { %v232_v61 = vmul.f32 %v475_v59, %v475_v59 }
 0x135   :  { %v230_v62 = vmul.f32 %v477_v60, %v477_v60 }
 0x136   :  { %239 = vadd.xlane.f32.xlu1 %v232_v61 }
 0x137   :  { %235 = vadd.xlane.f32.xlu2 %v230_v62 }
 0x1a1   :  { %v238_v63 = vpop.xlane.xlu0 %237 }
 0x1a2   :  { %v234_v0 = vpop.xlane.xlu2 %233  ;;  %v243_v1 = vadd.f32 1.0, %v238_v63 }
 0x1a3   :  { %v241_v24 = vadd.f32 1.0, %v234_v0 }
 0x1a4   :  { %v247_v2 = vmax.f32 %v243_v1, 1e-07 }
 0x1a5   :  { %v245_v3 = vmax.f32 %v241_v24, 1e-07 }
 0x1a6   :  { %378 = vrsqrt.f32 %v247_v2  ;;  %vm280_vm10 = vcmp.eq.f32.partialorder %v247_v2, inf  ;;  %vm282_vm11 = vcmp.eq.f32.partialorder %v247_v2, 0.0  ;;  %v283_v33 = vand.u32 2147483648, %v247_v2 }
 0x1a7   :  { %380 = vrsqrt.f32 %v245_v3  ;;  %vm256_vm12 = vcmp.eq.f32.partialorder %v245_v3, inf  ;;  %v259_v36 = vand.u32 2147483648, %v245_v3  ;;  %vm258_vm13 = vcmp.eq.f32.partialorder %v245_v3, 0.0 }
 0x1a9   :  { %v240_v25 = vpop.xlane.xlu1 %239 }
 0x1aa   :  { %v244_v4 = vadd.f32 1.0, %v240_v25  ;;  %v236_v5 = vpop.xlane.xlu2 %235 }
 0x1ab   :  { %v242_v6 = vadd.f32 1.0, %v236_v5 }
 0x1ac   :  { %v379_v8 = vpop.eup %378  ;;  %v248_v9 = vmax.f32 %v244_v4, 1e-07 }
 0x1ad   :  { %v381_v10 = vpop.eup %380  ;;  %v274_v11 = vmul.f32 %v379_v8, %v247_v2  ;;  %v246_v12 = vmax.f32 %v242_v6, 1e-07 }
 0x1ae   :  { %v250_v13 = vmul.f32 %v381_v10, %v245_v3  ;;  %382 = vrsqrt.f32 %v248_v9  ;;  %vm292_vm14 = vcmp.eq.f32.partialorder %v248_v9, inf  ;;  %v295_v51 = vand.u32 2147483648, %v248_v9 }
 0x1af   :  { %v275_v16 = vmul.f32 %v379_v8, %v274_v11  ;;  %384 = vrsqrt.f32 %v246_v12  ;;  %vm294_vm15 = vcmp.eq.f32.partialorder %v248_v9, 0.0  ;;  %vm268_vm0 = vcmp.eq.f32.partialorder %v246_v12, inf }
 0x1b0   :  { %v251_v17 = vmul.f32 %v381_v10, %v250_v13  ;;  %v271_v53 = vand.u32 2147483648, %v246_v12  ;;  %vm270_vm2 = vcmp.eq.f32.partialorder %v246_v12, 0.0 }
 0x1b1   :  { %v276_v18 = vmul.f32 0.5, %v275_v16 }
 0x1b2   :  { %v252_v19 = vmul.f32 0.5, %v251_v17 }
 0x1b3   :  { %v277_v20 = vsub.f32 1.5, %v276_v18 }
 0x1b4   :  { %v383_v21 = vpop.eup %382  ;;  %v253_v22 = vsub.f32 1.5, %v252_v19 }
 0x1b5   :  { %v385_v23 = vpop.eup %384  ;;  %v278_v26 = vmul.f32 %v379_v8, %v277_v20  ;;  %v286_v27 = vmul.f32 %v383_v21, %v248_v9 }
 0x1b6   :  { %v254_v28 = vmul.f32 %v381_v10, %v253_v22  ;;  %v262_v29 = vmul.f32 %v385_v23, %v246_v12 }
 0x1b7   :  { %v279_v30 = vmul.f32 %v278_v26, %v247_v2  ;;  %v287_v31 = vmul.f32 %v383_v21, %v286_v27 }
 0x1b8   :  { %v255_v32 = vmul.f32 %v254_v28, %v245_v3  ;;  %v263_v35 = vmul.f32 %v385_v23, %v262_v29 }
 0x1b9   :  { %v281_v34 = vsel %vm280_vm10, %v247_v2, %v279_v30  ;;  %v288_v37 = vmul.f32 0.5, %v287_v31 }
 0x1ba   :  { %v257_v38 = vsel %vm256_vm12, %v245_v3, %v255_v32  ;;  %v284_v39 = vsel %vm282_vm11, %v283_v33, %v281_v34  ;;  %v264_v40 = vmul.f32 0.5, %v263_v35 }
 0x1bb   :  { %v260_v41 = vsel %vm258_vm13, %v259_v36, %v257_v38  ;;  %v299_v42 = vsel %vm112_vm1, %v465_v47, %v284_v39  ;;  %v289_v43 = vsub.f32 1.5, %v288_v37 }
 0x1bc   :  { %v297_v44 = vsel %vm112_vm1, %v467_v49, %v260_v41  ;;  %303 = vst [vmem:[%s510_s3 + $0x10] sm:$0xff] %v299_v42  ;;  %v265_v45 = vsub.f32 1.5, %v264_v40 }
 0x1bd   :  { %301 = vst [vmem:[%s510_s3] sm:$0xff] %v297_v44  ;;  %v290_v46 = vmul.f32 %v383_v21, %v289_v43 }
 0x1be   :  { %v266_v48 = vmul.f32 %v385_v23, %v265_v45 }
 0x1bf   :  { %v291_v50 = vmul.f32 %v290_v46, %v248_v9 }
 0x1c0   :  { %v267_v47 = vmul.f32 %v266_v48, %v246_v12 }
 0x1c1   :  { %v293_v52 = vsel %vm292_vm14, %v248_v9, %v291_v50 }
 0x1c2   :  { %v296_v49 = vsel %vm294_vm15, %v295_v51, %v293_v52  ;;  %v269_v14 = vsel %vm268_vm0, %v246_v12, %v267_v47 }
 0x1c3   :  { %v300_v54 = vsel %vm112_vm1, %v475_v59, %v296_v49  ;;  %v272_v15 = vsel %vm270_vm2, %v271_v53, %v269_v14 }
 0x1c4   :  { %304 = vst [vmem:[%s510_s3 + $0x18] sm:$0xff] %v300_v54  ;;  %v298_v55 = vsel %vm112_vm1, %v477_v60, %v272_v15 }
 0x1c5   :  { %302 = vst [vmem:[%s510_s3 + $0x8] sm:$0xff] %v298_v55 }

</bundles_post_ra>
